<compile_context>
chip_gen: v7x
topology: tpu7x:2x2x1
jax: 0.10.0
libtpu: 0.0.40
codegen_flags: <defaults>
</compile_context>

<pallas_src>
import math

import jax
import jax.numpy as jnp
from jax import lax
from jax.experimental import pallas as pl
from jax.experimental.pallas import tpu as pltpu

EPS = 1e-5            # Llama2 rms_norm_eps
ROPE_THETA = 10000.0  # Llama2 rotary base


# ----------------------------- kernels -----------------------------

def norm_linear_nt_kernel(x_ref, g_ref, w_ref, o_ref):
    # Fused RMSNorm + y = norm(x) @ W^T.  x: (M, K); g: (1, K); w: (TN, K); o: (M, TN).
    # Norm is recomputed per N-tile (M is tiny at decode; the VPU work hides under the
    # weight DMA and keeps the grid axis "parallel" for megacore).
    x = x_ref[...].astype(jnp.float32)
    var = jnp.mean(x * x, axis=-1, keepdims=True)
    xn = x * lax.rsqrt(var + EPS) * g_ref[...].astype(jnp.float32)
    o_ref[...] = lax.dot_general(
        xn.astype(w_ref.dtype), w_ref[...],
        dimension_numbers=(((1,), (1,)), ((), ())),
        preferred_element_type=jnp.float32,
    ).astype(o_ref.dtype)


def linear_nt_res_kernel(x_ref, w_ref, r_ref, o_ref):
    # y = residual + x @ W^T   (W kept in PyTorch [out, in] layout -> NT dot, no host transpose).
    acc = lax.dot_general(
        x_ref[...].astype(w_ref.dtype), w_ref[...],
        dimension_numbers=(((1,), (1,)), ((), ())),
        preferred_element_type=jnp.float32,
    )
    o_ref[...] = (r_ref[...].astype(jnp.float32) + acc).astype(o_ref.dtype)


def norm_gated_mlp_kernel(x_ref, g_ref, wg_ref, wu_ref, o_ref):
    # Fused post-attention RMSNorm + silu(xn @ Wg^T) * (xn @ Wu^T), tiled over intermediate dim.
    x = x_ref[...].astype(jnp.float32)
    var = jnp.mean(x * x, axis=-1, keepdims=True)
    xn = (x * lax.rsqrt(var + EPS) * g_ref[...].astype(jnp.float32)).astype(wg_ref.dtype)
    g = lax.dot_general(xn, wg_ref[...], dimension_numbers=(((1,), (1,)), ((), ())),
                        preferred_element_type=jnp.float32)
    u = lax.dot_general(xn, wu_ref[...], dimension_numbers=(((1,), (1,)), ((), ())),
                        preferred_element_type=jnp.float32)
    o_ref[...] = (g * jax.nn.sigmoid(g) * u).astype(o_ref.dtype)


def attention_cache_kernel(qkv_ref, pk_ref, pv_ref, mask_ref, cos_ref, sinr_ref,
                           o_ref, ck_ref, cv_ref):
    # One grid step = one batch element, ALL heads at once.
    #   qkv_ref : (1, S_new, 3, NH, D)   pk/pv_ref : (1, NH, S_past, D)
    #   mask    : (1, 1, S_new, S_total) cos/sinr  : (1, S_new, D)  (sinr = sin * rotate_half sign)
    #   o_ref   : (1, S_new, NH, D)      ck/cv_ref : (1, NH, S_total, D)
    s_new = qkv_ref.shape[1]
    nh = qkv_ref.shape[3]
    d = qkv_ref.shape[4]
    s_past = pk_ref.shape[2]

    qkv = qkv_ref[0].astype(jnp.float32)           # (S_new, 3, NH, D)
    q, k, v = qkv[:, 0], qkv[:, 1], qkv[:, 2]      # each (S_new, NH, D)

    cos = cos_ref[0].astype(jnp.float32)           # (S_new, D)
    sinr = sinr_ref[0].astype(jnp.float32)         # sin pre-multiplied by the rotate-half sign

    # rotate_half(x) == roll(x, D/2, lanes) * sign; the sign lives inside sinr already (host-side).
    q2 = q.reshape(s_new * nh, d)
    k2 = k.reshape(s_new * nh, d)
    q_roll = pltpu.roll(q2, shift=d // 2, axis=1).reshape(s_new, nh, d)
    k_roll = pltpu.roll(k2, shift=d // 2, axis=1).reshape(s_new, nh, d)
    q_rot = q * cos[:, None, :] + q_roll * sinr[:, None, :]
    k_rot = k * cos[:, None, :] + k_roll * sinr[:, None, :]

    # Head-major views for the cache writes / batched matmuls (tiny at decode: S_new == 1).
    qh = jnp.swapaxes(q_rot, 0, 1) * (1.0 / math.sqrt(d))   # (NH, S_new, D), pre-scaled
    kh = jnp.swapaxes(k_rot, 0, 1)                          # (NH, S_new, D)
    vh = jnp.swapaxes(v, 0, 1)                               # (NH, S_new, D)

    # present = concat(past, new): written once, straight from the VMEM-resident past tiles.
    # TODO(synk): with a fixed-capacity cache interface this becomes an in-place S_new-row
    #             update via input_output_aliases (O(S_new) instead of O(S_total) HBM traffic).
    ck_ref[0, :, 0:s_past, :] = pk_ref[0]
    ck_ref[0, :, s_past:s_past + s_new, :] = kh.astype(ck_ref.dtype)
    cv_ref[0, :, 0:s_past, :] = pv_ref[0]
    cv_ref[0, :, s_past:s_past + s_new, :] = vh.astype(cv_ref.dtype)

    k_all = ck_ref[0].astype(jnp.float32)          # (NH, S_total, D)
    v_all = cv_ref[0].astype(jnp.float32)

    # Batched (over heads) scaled dot-product attention; softmax in fp32.
    scores = jnp.einsum("nsd,nkd->nsk", qh, k_all,
                        preferred_element_type=jnp.float32)           # (NH, S_new, S_total)
    scores = scores + mask_ref[0, 0].astype(jnp.float32)[None, :, :]
    m = jnp.max(scores, axis=-1, keepdims=True)
    p = jnp.exp(scores - m)
    attn = p * pl.reciprocal(jnp.sum(p, axis=-1, keepdims=True), approx=True)
    ctx = jnp.einsum("nsk,nkd->nsd", attn, v_all,
                     preferred_element_type=jnp.float32)              # (NH, S_new, D)
    o_ref[0] = jnp.swapaxes(ctx, 0, 1).astype(o_ref.dtype)            # (S_new, NH, D)


# ----------------------------- tiling / compiler-param helpers -----------------------------

def _pick_tn(n, k, itemsize, budget_bytes=8 << 20):
    """Largest lane-dense N tile that divides N and keeps a double-buffered (tn, K) weight
    tile inside the per-operand VMEM budget (safe on v7x's 64 MiB physical VMEM)."""
    for tn in (512, 384, 256, 128):
        if n % tn == 0 and 2 * tn * k * itemsize <= budget_bytes:
            return tn
    if n % 128 == 0:
        return 128
    return n   # small / irregular N only.  TODO(synk): pad irregular N instead of a full block.


def _cparams(sems, est_bytes=0):
    vmem = None
    if est_bytes > (12 << 20):                 # above the smallest default scoped VMEM (v5e)
        vmem = int(min(2 * est_bytes, 56 << 20))   # stay under v7x's 64 MiB physical VMEM
    return pltpu.CompilerParams(dimension_semantics=sems, vmem_limit_bytes=vmem)


# ----------------------------- wrappers -----------------------------

def _pallas_norm_linear_nt(x2d, gamma, w):
    m, k = x2d.shape
    n = w.shape[0]
    tn = _pick_tn(n, k, w.dtype.itemsize)
    est = 2 * tn * k * w.dtype.itemsize + 4 * m * (k + 2 * tn)
    return pl.pallas_call(
        norm_linear_nt_kernel,
        out_shape=jax.ShapeDtypeStruct((m, n), x2d.dtype),
        grid=(n // tn,),
        in_specs=[pl.BlockSpec((m, k), lambda j: (0, 0)),
                  pl.BlockSpec((1, k), lambda j: (0, 0)),
                  pl.BlockSpec((tn, k), lambda j: (j, 0))],
        out_specs=pl.BlockSpec((m, tn), lambda j: (0, j)),
        compiler_params=_cparams(("parallel",), est),
    )(x2d, gamma.reshape(1, k), w)


def _pallas_linear_nt_res(x2d, w, res2d):
    m, k = x2d.shape
    n = w.shape[0]
    tn = _pick_tn(n, k, w.dtype.itemsize)
    est = 2 * tn * k * w.dtype.itemsize + 4 * m * (k + 4 * tn)
    return pl.pallas_call(
        linear_nt_res_kernel,
        out_shape=jax.ShapeDtypeStruct((m, n), res2d.dtype),
        grid=(n // tn,),
        in_specs=[pl.BlockSpec((m, k), lambda j: (0, 0)),
                  pl.BlockSpec((tn, k), lambda j: (j, 0)),
                  pl.BlockSpec((m, tn), lambda j: (0, j))],
        out_specs=pl.BlockSpec((m, tn), lambda j: (0, j)),
        compiler_params=_cparams(("parallel",), est),
    )(x2d, w, res2d)


def _pallas_norm_gated_mlp(x2d, gamma, wg, wu):
    m, k = x2d.shape
    n = wg.shape[0]
    tn = _pick_tn(n, k, wg.dtype.itemsize)
    est = 2 * 2 * tn * k * wg.dtype.itemsize + 4 * m * (k + 2 * tn)
    return pl.pallas_call(
        norm_gated_mlp_kernel,
        out_shape=jax.ShapeDtypeStruct((m, n), x2d.dtype),
        grid=(n // tn,),
        in_specs=[pl.BlockSpec((m, k), lambda j: (0, 0)),
                  pl.BlockSpec((1, k), lambda j: (0, 0)),
                  pl.BlockSpec((tn, k), lambda j: (j, 0)),
                  pl.BlockSpec((tn, k), lambda j: (j, 0))],
        out_specs=pl.BlockSpec((m, tn), lambda j: (0, j)),
        compiler_params=_cparams(("parallel",), est),
    )(x2d, gamma.reshape(1, k), wg, wu)


def _pallas_attention_cache(qkv, past_k, past_v, mask, cos, sin_signed):
    b, s_new, three, nh, d = qkv.shape
    assert three == 3
    assert mask.shape[1] == 1, "expects an HF-style (B, 1, S_new, S_total) additive mask"
    s_past = past_k.shape[2]
    s_total = s_past + s_new
    out_shape = (
        jax.ShapeDtypeStruct((b, s_new, nh, d), qkv.dtype),       # attention context
        jax.ShapeDtypeStruct((b, nh, s_total, d), past_k.dtype),  # present_k
        jax.ShapeDtypeStruct((b, nh, s_total, d), past_v.dtype),  # present_v
    )
    return pl.pallas_call(
        attention_cache_kernel,
        out_shape=out_shape,
        grid=(b,),
        in_specs=[
            pl.BlockSpec((1, s_new, 3, nh, d), lambda i: (i, 0, 0, 0, 0)),   # fused qkv
            pl.BlockSpec((1, nh, s_past, d), lambda i: (i, 0, 0, 0)),        # past_k
            pl.BlockSpec((1, nh, s_past, d), lambda i: (i, 0, 0, 0)),        # past_v
            pl.BlockSpec((1, 1, s_new, s_total), lambda i: (i, 0, 0, 0)),    # mask
            pl.BlockSpec((1, s_new, d), lambda i: (i, 0, 0)),                # cos
            pl.BlockSpec((1, s_new, d), lambda i: (i, 0, 0)),                # sin * sign
        ],
        out_specs=(
            pl.BlockSpec((1, s_new, nh, d), lambda i: (i, 0, 0, 0)),
            pl.BlockSpec((1, nh, s_total, d), lambda i: (i, 0, 0, 0)),
            pl.BlockSpec((1, nh, s_total, d), lambda i: (i, 0, 0, 0)),
        ),
        compiler_params=_cparams(("parallel",)),
    )(qkv, past_k, past_v, mask, cos, sin_signed)


# ----------------------------- host-side glue -----------------------------

def rope_cos_sin(position_ids, head_dim, theta=ROPE_THETA):
    # Tiny rotary tables from position_ids (same as LlamaRotaryEmbedding).
    inv_freq = 1.0 / (theta ** (jnp.arange(0, head_dim, 2, dtype=jnp.float32) / head_dim))
    freqs = position_ids.astype(jnp.float32)[..., None] * inv_freq[None, None, :]
    emb = jnp.concatenate([freqs, freqs], axis=-1)          # [B, S, D]
    return jnp.cos(emb), jnp.sin(emb)


def _rot_half_sign(d):
    return jnp.concatenate([jnp.full((d // 2,), -1.0, jnp.float32),
                            jnp.ones((d // 2,), jnp.float32)])


def prepare_params(raw, weight_dtype=jnp.bfloat16):
    """One-time weight prep: concatenate Wq/Wk/Wv and cast projection/MLP weights to bf16
    (decode is weight-HBM-bound; the kernels cast activations to the weight dtype)."""
    return dict(
        num_heads=raw["num_heads"],
        input_ln=raw["input_ln"].astype(jnp.float32),
        post_ln=raw["post_ln"].astype(jnp.float32),
        wqkv=jnp.concatenate([raw["wq"], raw["wk"], raw["wv"]], axis=0).astype(weight_dtype),
        wo=raw["wo"].astype(weight_dtype),
        wg=raw["wg"].astype(weight_dtype),
        wu=raw["wu"].astype(weight_dtype),
        wd=raw["wd"].astype(weight_dtype),
    )


def block_cache_forward(hidden_states, position_ids, attention_mask, past_k, past_v, params):
    """One Llama2 decoder layer with KV cache, returns (hidden, present_k, present_v)."""
    b, s_new, h = hidden_states.shape
    nh = params["num_heads"]
    d = h // nh

    x2d = hidden_states.reshape(b * s_new, h)

    # ---- self-attention block: fused RMSNorm + QKV (one weight-streaming grid) ----
    qkv2d = _pallas_norm_linear_nt(x2d, params["input_ln"], params["wqkv"])     # (M, 3H)
    qkv = qkv2d.reshape(b, s_new, 3, nh, d)      # free reshape -- no XLA head transposes

    cos, sin = rope_cos_sin(position_ids, d)
    sin_signed = sin * _rot_half_sign(d)         # rotate-half sign folded in once on the host

    attn, present_k, present_v = _pallas_attention_cache(
        qkv, past_k, past_v, attention_mask, cos, sin_signed)
    attn2d = attn.reshape(b * s_new, h)          # (B, S, NH, D) -> (M, H): free reshape

    h1 = _pallas_linear_nt_res(attn2d, params["wo"], x2d)        # o_proj + residual fused

    # ---- MLP block: fused RMSNorm + gated MLP, then down_proj + residual ----
    act = _pallas_norm_gated_mlp(h1, params["post_ln"], params["wg"], params["wu"])
    out2d = _pallas_linear_nt_res(act, params["wd"], h1)         # down_proj + residual fused

    return out2d.reshape(b, s_new, h), present_k, present_v


# ----------------------------- reference (precision-matched) -----------------------------

def block_cache_ref(hidden_states, position_ids, attention_mask, past_k, past_v, params):
    b, s, h = hidden_states.shape
    nh = params["num_heads"]
    d = h // nh

    def rms(x, w):
        xf = x.astype(jnp.float32)
        var = jnp.mean(xf * xf, axis=-1, keepdims=True)
        return xf * lax.rsqrt(var + EPS) * w.astype(jnp.float32)

    def mm_nt(x2d, w):  # y = x @ w.T, same precision policy as the kernels
        return lax.dot_general(x2d.astype(w.dtype), w,
                               dimension_numbers=(((1,), (1,)), ((), ())),
                               preferred_element_type=jnp.float32)

    x2d = hidden_states.reshape(b * s, h)
    wq, wk, wv = (params["wqkv"][i * h:(i + 1) * h] for i in range(3))

    xn = rms(x2d, params["input_ln"])
    q = mm_nt(xn, wq).reshape(b, s, nh, d).transpose(0, 2, 1, 3)
    k = mm_nt(xn, wk).reshape(b, s, nh, d).transpose(0, 2, 1, 3)
    v = mm_nt(xn, wv).reshape(b, s, nh, d).transpose(0, 2, 1, 3)

    cos, sin = rope_cos_sin(position_ids, d)
    cos_b, sin_b = cos[:, None], sin[:, None]

    def rot_half(t):
        h2 = t.shape[-1] // 2
        return jnp.concatenate([-t[..., h2:], t[..., :h2]], axis=-1)

    qe = q * cos_b + rot_half(q) * sin_b
    ke = k * cos_b + rot_half(k) * sin_b

    pk = jnp.concatenate([past_k, ke], axis=2)
    pv = jnp.concatenate([past_v, v], axis=2)

    scores = jnp.einsum("bhqd,bhkd->bhqk", qe, pk,
                        precision=lax.Precision.HIGHEST) / math.sqrt(d)
    scores = scores + attention_mask
    attn = jax.nn.softmax(scores.astype(jnp.float32), axis=-1)
    ctx = jnp.einsum("bhqk,bhkd->bhqd", attn, pv, precision=lax.Precision.HIGHEST)
    ctx2d = ctx.transpose(0, 2, 1, 3).reshape(b * s, h)

    h1 = x2d + mm_nt(ctx2d, params["wo"])
    h1n = rms(h1, params["post_ln"])
    g = mm_nt(h1n, params["wg"])
    u = mm_nt(h1n, params["wu"])
    out2d = h1 + mm_nt(g * jax.nn.sigmoid(g) * u, params["wd"])
    return out2d.reshape(b, s, h), pk, pv


# ----------------------------- demo -----------------------------

if __name__ == "__main__":
    B, S_NEW, S_PAST = 2, 1, 8
    NUM_HEADS, HEAD_DIM = 2, 128
    H = NUM_HEADS * HEAD_DIM          # 256
    INTER = 512
    S_TOTAL = S_PAST + S_NEW

    key = jax.random.PRNGKey(0)
    ks = jax.random.split(key, 12)

    hidden_states = jax.random.normal(ks[0], (B, S_NEW, H), dtype=jnp.float32)
    position_ids = jnp.full((B, S_NEW), S_PAST, dtype=jnp.int32)
    attention_mask = jnp.zeros((B, 1, S_NEW, S_TOTAL), dtype=jnp.float32)
    attention_mask = attention_mask.at[1, 0, 0, :2].set(-1e9)   # mask 2 cache slots of batch 1
    past_k = 0.5 * jax.random.normal(ks[1], (B, NUM_HEADS, S_PAST, HEAD_DIM), dtype=jnp.float32)
    past_v = 0.5 * jax.random.normal(ks[2], (B, NUM_HEADS, S_PAST, HEAD_DIM), dtype=jnp.float32)

    ws = 1.0 / math.sqrt(H)
    raw_params = dict(
        num_heads=NUM_HEADS,
        input_ln=1.0 + 0.01 * jax.random.normal(ks[3], (H,), dtype=jnp.float32),
        post_ln=1.0 + 0.01 * jax.random.normal(ks[4], (H,), dtype=jnp.float32),
        wq=ws * jax.random.normal(ks[5], (H, H), dtype=jnp.float32),
        wk=ws * jax.random.normal(ks[6], (H, H), dtype=jnp.float32),
        wv=ws * jax.random.normal(ks[7], (H, H), dtype=jnp.float32),
        wo=ws * jax.random.normal(ks[8], (H, H), dtype=jnp.float32),
        wg=ws * jax.random.normal(ks[9], (INTER, H), dtype=jnp.float32),
        wu=ws * jax.random.normal(ks[10], (INTER, H), dtype=jnp.float32),
        wd=(1.0 / math.sqrt(INTER)) * jax.random.normal(ks[11], (H, INTER), dtype=jnp.float32),
    )
    params = prepare_params(raw_params, weight_dtype=jnp.bfloat16)   # bf16 weight streaming

    out, present_k, present_v = block_cache_forward(
        hidden_states, position_ids, attention_mask, past_k, past_v, params)
    jax.block_until_ready((out, present_k, present_v))

    ref_out, ref_k, ref_v = block_cache_ref(
        hidden_states, position_ids, attention_mask, past_k, past_v, params)

    assert out.shape == (B, S_NEW, H)
    assert present_k.shape == (B, NUM_HEADS, S_TOTAL, HEAD_DIM)
    assert present_v.shape == (B, NUM_HEADS, S_TOTAL, HEAD_DIM)
    assert jnp.allclose(present_k, ref_k, atol=2e-3, rtol=2e-3), "present_k mismatch"
    assert jnp.allclose(present_v, ref_v, atol=2e-3, rtol=2e-3), "present_v mismatch"
    assert jnp.allclose(out, ref_out, atol=5e-2, rtol=5e-2), "hidden_states mismatch"

    print("KERNEL_OK")
</pallas_src>

<mosaic_0001>
module attributes {stable_mosaic.version = 11 : i64} {
  func.func @norm_linear_nt_kernel(%arg0: i32, %arg1: memref<2x256xf32, #tpu.memory_space<vmem>>, %arg2: memref<1x256xf32, #tpu.memory_space<vmem>>, %arg3: memref<384x256xbf16, #tpu.memory_space<vmem>>, %arg4: memref<2x384xf32, #tpu.memory_space<vmem>>) attributes {dimension_semantics = [#tpu.dimension_semantics<parallel>], iteration_bounds = array<i64: 2>, scalar_prefetch = 0 : i64, scratch_operands = 0 : i64, tpu.core_type = #tpu.core_type<tc>, window_params = [{pipeline_mode = #tpu.pipeline_mode<synchronous>, transform_indices = @transform_0, window_bounds = array<i64: 2, 256>}, {pipeline_mode = #tpu.pipeline_mode<synchronous>, transform_indices = @transform_1, window_bounds = array<i64: 1, 256>}, {transform_indices = @transform_2, window_bounds = array<i64: 384, 256>}, {transform_indices = @transform_3, window_bounds = array<i64: 2, 384>}]} {
    %c0 = arith.constant 0 : index
    %c0_0 = arith.constant 0 : index
    %0 = vector.load %arg1[%c0, %c0_0] : memref<2x256xf32, #tpu.memory_space<vmem>>, vector<2x256xf32>
    %1 = arith.mulf %0, %0 : vector<2x256xf32>
    %cst = arith.constant dense<0.000000e+00> : vector<2xf32>
    %2 = vector.multi_reduction <add>, %1, %cst [1] : vector<2x256xf32> to vector<2xf32>
    %3 = vector.shape_cast %2 : vector<2xf32> to vector<2x1xf32>
    %cst_1 = arith.constant 2.560000e+02 : f32
    %4 = vector.broadcast %cst_1 : f32 to vector<2x1xf32>
    %5 = arith.divf %3, %4 : vector<2x1xf32>
    %cst_2 = arith.constant 9.99999974E-6 : f32
    %6 = vector.broadcast %cst_2 : f32 to vector<2x1xf32>
    %7 = arith.addf %5, %6 : vector<2x1xf32>
    %8 = math.rsqrt %7 : vector<2x1xf32>
    %9 = vector.broadcast %8 : vector<2x1xf32> to vector<2x256xf32>
    %10 = arith.mulf %0, %9 : vector<2x256xf32>
    %c0_3 = arith.constant 0 : index
    %c0_4 = arith.constant 0 : index
    %11 = vector.load %arg2[%c0_3, %c0_4] : memref<1x256xf32, #tpu.memory_space<vmem>>, vector<1x256xf32>
    %12 = vector.broadcast %11 : vector<1x256xf32> to vector<2x256xf32>
    %13 = arith.mulf %10, %12 : vector<2x256xf32>
    %14 = arith.truncf %13 : vector<2x256xf32> to vector<2x256xbf16>
    %c0_5 = arith.constant 0 : index
    %c0_6 = arith.constant 0 : index
    %15 = vector.load %arg3[%c0_5, %c0_6] : memref<384x256xbf16, #tpu.memory_space<vmem>>, vector<384x256xbf16>
    %cst_7 = arith.constant dense<0.000000e+00> : vector<2x384xf32>
    %16 = tpu.matmul %14, %15, %cst_7 {dimension_numbers = #tpu.dot_dimension_numbers<[1], [1], [0], [0], [0, 0, 1, 0], [], []>} : vector<2x256xbf16>, vector<384x256xbf16>, vector<2x384xf32> -> vector<2x384xf32>
    %c0_8 = arith.constant 0 : index
    %c0_9 = arith.constant 0 : index
    %17 = vector.load %arg4[%c0_8, %c0_9] : memref<2x384xf32, #tpu.memory_space<vmem>>, vector<2x384xf32>
    tpu.vector_store %arg4[%c0_8, %c0_9], %16 {strides = array<i32>} : memref<2x384xf32, #tpu.memory_space<vmem>>, vector<2x384xf32>,
    return
  }
  func.func @transform_0(%arg0: i32) -> (i32, i32) {
    %c0_i32 = arith.constant 0 : i32
    %c0_i32_0 = arith.constant 0 : i32
    %c0_i32_1 = arith.constant 0 : i32
    return %c0_i32, %c0_i32_0 : i32, i32
  }
  func.func @transform_1(%arg0: i32) -> (i32, i32) {
    %c0_i32 = arith.constant 0 : i32
    %c0_i32_0 = arith.constant 0 : i32
    %c0_i32_1 = arith.constant 0 : i32
    return %c0_i32, %c0_i32_0 : i32, i32
  }
  func.func @transform_2(%arg0: i32) -> (i32, i32) {
    %c0_i32 = arith.constant 0 : i32
    %c0_i32_0 = arith.constant 0 : i32
    return %arg0, %c0_i32 : i32, i32
  }
  func.func @transform_3(%arg0: i32) -> (i32, i32) {
    %c0_i32 = arith.constant 0 : i32
    %c0_i32_0 = arith.constant 0 : i32
    return %c0_i32, %arg0 : i32, i32
  }
}

</mosaic_0001>

<bundles_post_ra>
// kernel: tpu_custom_call.1
= control target key start
LH: loop header
LB: loop body
LE: loop exit
PB: predicated region body
PF: predicated region fallthrough
CT: control target
= control target key end

     0   :  { %8 = vsyncpa [#allocation3], 0  ;;  %s1385_s0 = inlined_call_operand.hbm [shape: f32[2,256], index: 0, kind: input, shape index: {}]   ;;  %s1386_s1 = inlined_call_operand.vmem [shape: f32[1,256], index: 1, kind: input, shape index: {}]   ;;  %s1387_s2 = inlined_call_operand.hbm [shape: bf16[768,256], index: 2, kind: input, shape index: {}]   ;;  %s1388_s3 = inlined_call_operand.hbm [shape: f32[2,768], index: 3, kind: output, shape index: {}]  }
   0x1   :  { %9 = vsyncpa [#allocation6], 0 }
   0x2   :  { %11 = vsyncpa [#allocation6 + $0x1], 0 }
   0x3   :  { %12 = vsyncpa [#allocation4], 0 }
   0x4   :  { %14 = vsyncpa [#allocation4 + $0x1], 0  ;;  %s1117_s12 = smov 0   ;;  %s1119_s13 = smov 0  }
   0x5   :  { %s1121_s14 = smov 0   ;;  %s1123_s15 = smov 0  }
   0x6 LB: > { %s1138_s16 = sadd.s32 4294967295, %s1088_s15   ;;  %s759_s17 = sadd.s32 4294967294, %s1088_s15   ;;  %s1088_s15 = sphi %s1123_s15, %s1413_s15   ;;  %s1084_s14 = sphi %s1121_s14, %s1412_s14   ;;  %s1080_s13 = sphi %s1119_s13, %s1411_s13   ;;  %s1076_s12 = sphi %s1117_s12, %s1410_s12  }
   0x7   : > { %s1142_s18 = sadd.s32 1, %s1088_s15   ;;  %s69_s19 = sadd.s32 1, %s1084_s14 }
   0x8   : > { %s66_s20 = ssub.s32 %s1088_s15, %s1142_s18  ;;  %p76_p0 = scmp.ne.s32.totalorder %s1084_s14, %s1080_s13 }
   0x9   : > { %p67_p1 = scmp.eq.s32.totalorder %s66_s20, 0  ;;  %p77_p2 = scmp.eq.s32.totalorder %s1088_s15, 0 }
   0xa   : > { %p82_p3 = scmp.ne.s32.totalorder %s1080_s13, %s1076_s12  ;;  %p1389_p4 = scmp.eq.s32.totalorder %s1138_s16, 0 }
   0xb   : > { %s1154_s21 = scalar_select %p67_p1, %s1084_s14, %s69_s19  }
   0xc   : > { %p1156_p5 = por %p77_p2, %p76_p0  ;;  %p1162_p6 = por %p1389_p4, %p82_p3 }
   0xd   : > { %p106_p7 = scmp.eq.s32.totalorder %s1138_s16, 1  ;;  %p112_p8 = scmp.eq.s32.totalorder %s759_s17, 1 }
   0xe   : > { %s1395_s23 = scalar_select %p1162_p6, 1, 0 }
   0xf   : > { %p760_p9 = scmp.ge.s32.totalorder %s1088_s15, 1  ;;  %p119_p10 = scmp.lt.s32.totalorder %s1088_s15, 3 }
  0x10   : > { %p1169_p11 = por %p106_p7, %p76_p0  ;;  %p1173_p12 = por %p112_p8, %p82_p3 }
  0x11   : > { %p1177_p13 = pnand %p760_p9, %p119_p10  ;;  %s1090_s27 = smov [#allocation2]  }
  0x12   : > { %s1396_s24 = scalar_select %p1169_p11, 1, 0 }
  0x13   : > { %s1397_s25 = scalar_select %p1173_p12, 1, 0 }
  0x14   : > { %s1398_s26 = scalar_select %p1177_p13, 1, 0 }
  0x15   : > { %p833_p2 = pneg %p1177_p13  ;;  %s132_s28 = sshll.u32 %s1090_s27, 4  ;;  %s133_s28 = int_to_ptr.vmem [resolvable:$true] %s132_s28 }
  0x16   : > { %p846_p4 = scmp.lt.s32.totalorder %s1088_s15, 2  ;;  %p1399_p0 = scmp.eq.s32.totalorder %s1138_s16, 0 }
  0x17   : > { %s146_s30 = sand.u32 1, %s1084_s14   ;;  %s960_s8 = scalar_lea.hbm %s1385_s0, 64 }
  0x18   : > { %p1187_p7 = pnand %p833_p2, %p1399_p0  ;;  %p1194_p3 = pnand %p846_p4, %p1156_p5 }
  0x19   : > { %s822_s5 = smul.u32 384, %s146_s30  ;;  %p961_p8 = scmp.ne.s32.totalorder %s1385_s0, %s960_s8 }
  0x1a   : > { %s1401_s4 = scalar_select %p1194_p3, 1, 0 }
  0x1b   : > { %p962_p9 = pneg %p1187_p7  ;;  %p967_p4 = scmp.lt.u32.totalorder %s960_s8, %s1385_s0 }
  0x1d   : > { %p963_p10 = pnand %p962_p9, %p961_p8 }
  0x1f   : > { %p964_p2 = pneg %p963_p10 }
  0x21   : > { %p969_p5 = pnand %p967_p4, %p964_p2 }
  0x23   : > { %972 = shalt.err (!%p969_p5)
}
  0x24   : > { %s973_s19 = scalar_lea.vmem %s133_s28, 64  ;;  %p981_p11 = scmp.lt.s32.totalorder %s133_s28, %s133_s28 }
  0x25   : > { %p974_p0 = scmp.ne.s32.totalorder %s133_s28, %s973_s19  ;;  %p982_p6 = scmp.lt.s32.totalorder %s973_s19, %s973_s19 }
  0x27   : > { %p976_p1 = pnand %p974_p0, %p962_p9  ;;  %p983_p13 = por %p982_p6, %p981_p11 }
  0x29   : > { %p977_p12 = pneg %p976_p1 }
  0x2b   : > { %p984_p3 = pnand %p983_p13, %p977_p12 }
  0x2d   : > { %987 = shalt.err (!%p984_p3)
}
  0x2e   : > { %836 = dma.hbm_to_vmem [thread:$0]  (!%p1187_p7), %s1385_s0, 64, %s133_s28, [#allocation3]  }
  0x2f   : > { %s821_s27 = smul.u32 6144, %s1088_s15  ;;  %s150_s6 = scalar_lea.vmem [#allocation5], %s822_s5 }
  0x30   : > { %s158_s7 = sshll.u32 %s150_s6, 4  ;;  %s1222_s29 = scalar_lea.sflag [#allocation6], %s146_s30  ;;  %s1215_s7 = int_to_ptr.vmem [resolvable:$true] %s158_s7 }
  0x31   : > { %s1220_s10 = scalar_lea.hbm %s1387_s2, %s821_s27  ;;  %p1402_p11 = scmp.ne.s32.totalorder %s1401_s4, 0 }
  0x32   : > { %s988_s11 = scalar_lea.hbm %s1220_s10, 6144  ;;  %s993_s17 = scalar_lea.hbm %s1387_s2, 12288 }
  0x33   : > { %p989_p6 = scmp.ne.s32.totalorder %s1220_s10, %s988_s11  ;;  %p990_p12 = pneg %p1402_p11 }
  0x34   : > { %p994_p7 = scmp.lt.u32.totalorder %s1220_s10, %s1387_s2  ;;  %p995_p3 = scmp.lt.u32.totalorder %s993_s17, %s988_s11 }
  0x35   : > { %p991_p13 = pnand %p990_p12, %p989_p6  ;;  %p997_p9 = scmp.lt.u32.totalorder %s988_s11, %s1220_s10 }
  0x36   : > { %p996_p8 = por %p995_p3, %p994_p7 }
  0x37   : > { %p992_p1 = pneg %p991_p13 }
  0x38   : > { %p998_p10 = por %p997_p9, %p996_p8 }
  0x3a   : > { %p999_p2 = pnand %p998_p10, %p992_p1 }
  0x3c   : > { %1002 = shalt.err (!%p999_p2)
}
  0x3d   : > { %s1003_s30 = scalar_lea.vmem %s1215_s7, 6144  ;;  %s1091_s22 = smov [#allocation5]  }
  0x3e   : > { %p1004_p4 = scmp.ne.s32.totalorder %s1215_s7, %s1003_s30  ;;  %s1008_s27 = sshll.u32 %s1091_s22, 4  ;;  %s1009_s27 = int_to_ptr.vmem [resolvable:$false] %s1008_s27 }
  0x3f   : > { %s1010_s6 = scalar_lea.vmem %s1009_s27, 12288  ;;  %p1011_p6 = scmp.lt.s32.totalorder %s1215_s7, %s1009_s27 }
  0x40   : > { %p1006_p5 = pnand %p1004_p4, %p990_p12  ;;  %p1012_p13 = scmp.lt.s32.totalorder %s1010_s6, %s1003_s30 }
  0x42   : > { %p1007_p0 = pneg %p1006_p5  ;;  %p1013_p7 = por %p1012_p13, %p1011_p6 }
  0x44   : > { %p1014_p3 = pnand %p1013_p7, %p1007_p0 }
  0x46   : > { %1017 = shalt.err (!%p1014_p3)
}
  0x47   : > { %s1092_s8 = smov 128   ;;  %s1093_s9 = smov 8  }
  0x48   : > { %840 = dma.hbm_to_vmem [thread:$0]  (!%p1402_p11), %s1220_s10, 6144, %s1215_s7, %s1222_s29, %s1092_s8, %s1092_s8, %s1093_s9  }
  0x49   : > { %p1403_p12 = scmp.ne.s32.totalorder %s1398_s26, 0 }
  0x4a   : > { %p1404_p1 = scmp.eq.s32.totalorder (!%p1403_p12), %s1138_s16, 0 }
  0x4b   : > { %170 = sbr.rel (%p1403_p12) target bundleno = 505 (0x1f9), region = 32 }
  0x52   : > { %1063 = dma.done.wait (%p1404_p1), [#allocation3], 64   ;;  %p1405_p8 = pmov %p1404_p1 }
  0x53   : > { %s1257_s11 = sand.u32 1, %s1080_s13   ;;  %p1406_p11 = scmp.ne.s32.totalorder %s1395_s23, 0 }
  0x54   : > { %1065 = vsyncadd (%p1405_p8), [#allocation3], 4294967232  ;;  %s823_s28 = smul.u32 384, %s1257_s11  ;;  %s177_s5 = scalar_lea.sflag [#allocation6], %s1257_s11 }
  0x56   : > { %s1261_s17 = scalar_lea.vmem [#allocation5], %s823_s28 }
  0x57   : > { %1067 = dma.done.wait (%p1406_p11), %s177_s5, 6144  }
  0x58   : > { %1069 = vsyncadd (%p1406_p11), %s177_s5, 4294961152  ;;  %v212_v0 = vlaneseq  ;;  %v1094_v1 = vmov 1983009808   ;;  %v1272_v6 = vld [vmem:[#allocation2] sm:$0xf]  ;;  %vm219_vm0 = vcmask 1041408  }
  0x59   : > { %v210_v2 = vunpack.c.l.s4 %v1094_v1  ;;  %v207_v7 = vmul.f32 %v1272_v6, %v1272_v6  ;;  %v886_v8 = vld [vmem:[%s1261_s17 + $0x4] ss:$8 sps:$4 sm:$0xff]   ;;  %v888_v9 = vld [vmem:[%s1261_s17] ss:$8 sps:$4 sm:$0xff]   ;;  %v889_v10 = vld [vmem:[%s1261_s17 + $0x14] ss:$8 sps:$4 sm:$0xff]  }
  0x5a   : > { %v1267_v3 = vshrl.u32 %v212_v0, 7  ;;  %560 = vmatprep.subr.bf16.mxu0 %v886_v8  ;;  %v891_v16 = vld [vmem:[%s1261_s17 + $0x10] ss:$8 sps:$4 sm:$0xff]   ;;  %v892_v17 = vld [vmem:[%s1261_s17 + $0x24] ss:$8 sps:$4 sm:$0xff]   ;;  %s824_s4 = smul.u32 6, %s1257_s11 }
  0x5b   : > { %v211_v4 = vunpack.c.0.s8 %v210_v2  ;;  %561 = vmatpush1.bf16.xpose.msra.mxu0 %v888_v9  ;;  %v912_v18 = vld [vmem:[%s1261_s17 + $0x104] ss:$8 sps:$4 sm:$0xff]   ;;  %v915_v19 = vld [vmem:[%s1261_s17 + $0x100] ss:$8 sps:$4 sm:$0xff]   ;;  %v918_v20 = vld [vmem:[%s1261_s17 + $0x114] ss:$8 sps:$4 sm:$0xff]  }
  0x5c   : > { %562 = vmatprep.subr.bf16.mxu0 %v889_v10  ;;  %601 = vmatprep.subr.bf16.mxu1 %v912_v18  ;;  %v894_v21 = vld [vmem:[%s1261_s17 + $0x20] ss:$8 sps:$4 sm:$0xff]   ;;  %v895_v22 = vld [vmem:[%s1261_s17 + $0x34] ss:$8 sps:$4 sm:$0xff]   ;;  %v921_v23 = vld [vmem:[%s1261_s17 + $0x110] ss:$8 sps:$4 sm:$0xff]  }
  0x5d   : > { %v1270_v5 = vsub.s32 %v211_v4, %v1267_v3  ;;  %602 = vmatpush1.bf16.xpose.msra.mxu1 %v915_v19  ;;  %v924_v24 = vld [vmem:[%s1261_s17 + $0x124] ss:$8 sps:$4 sm:$0xff]   ;;  %v897_v25 = vld [vmem:[%s1261_s17 + $0x30] ss:$8 sps:$4 sm:$0xff]   ;;  %v927_v27 = vld [vmem:[%s1261_s17 + $0x120] ss:$8 sps:$4 sm:$0xff]  }
  0x5e   : > { %603 = vmatprep.subr.bf16.mxu1 %v918_v20  ;;  %v898_v26 = vld [vmem:[%s1261_s17 + $0x44] ss:$8 sps:$4 sm:$0xff]   ;;  %v930_v28 = vld [vmem:[%s1261_s17 + $0x134] ss:$8 sps:$4 sm:$0xff]   ;;  %v900_v29 = vld [vmem:[%s1261_s17 + $0x40] ss:$8 sps:$4 sm:$0xff]  }
  0x5f   : > { %v215_v11 = vrot.slane %v207_v7, %v1270_v5  ;;  %v901_v30 = vld [vmem:[%s1261_s17 + $0x54] ss:$8 sps:$4 sm:$0xff]   ;;  %v933_v31 = vld [vmem:[%s1261_s17 + $0x130] ss:$8 sps:$4 sm:$0xff]   ;;  %v936_v32 = vld [vmem:[%s1261_s17 + $0x144] ss:$8 sps:$4 sm:$0xff]  }
  0x60   : > { %v903_v33 = vld [vmem:[%s1261_s17 + $0x50] ss:$8 sps:$4 sm:$0xff]   ;;  %v904_v34 = vld [vmem:[%s1261_s17 + $0x64] ss:$8 sps:$4 sm:$0xff]   ;;  %v939_v35 = vld [vmem:[%s1261_s17 + $0x140] ss:$8 sps:$4 sm:$0xff]  }
  0x61   : > { %v216_v12 = vcombine.high %v215_v11, %v215_v11  ;;  %v220_v13 = vsel %vm219_vm0, %v215_v11, 0.0  ;;  %v942_v36 = vld [vmem:[%s1261_s17 + $0x154] ss:$8 sps:$4 sm:$0xff]   ;;  %v906_v37 = vld [vmem:[%s1261_s17 + $0x60] ss:$8 sps:$4 sm:$0xff]   ;;  %v243_v2 = vsub.s32 0, %v1267_v3 }
  0x62   : > { %v907_v38 = vld [vmem:[%s1261_s17 + $0x74] ss:$8 sps:$4 sm:$0xff]   ;;  %v945_v39 = vld [vmem:[%s1261_s17 + $0x150] ss:$8 sps:$4 sm:$0xff]   ;;  %v948_v40 = vld [vmem:[%s1261_s17 + $0x164] ss:$8 sps:$4 sm:$0xff]  }
  0x63   : > { %v221_v14 = vsel %vm219_vm0, %v216_v12, 0.0  ;;  %563 = vmatpush1.bf16.xpose.msra.mxu0 %v891_v16  ;;  %v909_v41 = vld [vmem:[%s1261_s17 + $0x70] ss:$8 sps:$4 sm:$0xff]   ;;  %v910_v42 = vld [vmem:[%s1261_s17 + $0x84] ss:$8 sps:$4 sm:$0xff]   ;;  %v247_v4 = vsub.s32 1, %v1267_v3 }
  0x64   : > { %v222_v15 = vadd.f32 %v221_v14, %v220_v13  ;;  %564 = vmatprep.subr.bf16.mxu0 %v892_v17  ;;  %v951_v43 = vld [vmem:[%s1261_s17 + $0x160] ss:$8 sps:$4 sm:$0xff]   ;;  %v954_v44 = vld [vmem:[%s1261_s17 + $0x174] ss:$8 sps:$4 sm:$0xff]   ;;  %v957_v47 = vld [vmem:[%s1261_s17 + $0x170] ss:$8 sps:$4 sm:$0xff]  }
  0x65   : > { %604 = vmatpush1.bf16.xpose.msra.mxu1 %v921_v23  ;;  %v914_v45 = vld [vmem:[%s1261_s17 + $0x80] ss:$8 sps:$4 sm:$0xff]   ;;  %v916_v46 = vld [vmem:[%s1261_s17 + $0x94] ss:$8 sps:$4 sm:$0xff]   ;;  %v920_v48 = vld [vmem:[%s1261_s17 + $0x90] ss:$8 sps:$4 sm:$0xff]  }
  0x66   : > { %223 = vadd.xlane.f32.xlu0 %v222_v15  ;;  %605 = vmatprep.subr.bf16.mxu1 %v924_v24  ;;  %v922_v49 = vld [vmem:[%s1261_s17 + $0xa4] ss:$8 sps:$4 sm:$0xff]   ;;  %v926_v50 = vld [vmem:[%s1261_s17 + $0xa0] ss:$8 sps:$4 sm:$0xff]   ;;  %v928_v51 = vld [vmem:[%s1261_s17 + $0xb4] ss:$8 sps:$4 sm:$0xff]  }
  0x67   : > { %v932_v52 = vld [vmem:[%s1261_s17 + $0xb0] ss:$8 sps:$4 sm:$0xff]   ;;  %v934_v53 = vld [vmem:[%s1261_s17 + $0xc4] ss:$8 sps:$4 sm:$0xff]   ;;  %v938_v54 = vld [vmem:[%s1261_s17 + $0xc0] ss:$8 sps:$4 sm:$0xff]  }
  0x68   : > { %v940_v55 = vld [vmem:[%s1261_s17 + $0xd4] ss:$8 sps:$4 sm:$0xff]   ;;  %v944_v56 = vld [vmem:[%s1261_s17 + $0xd0] ss:$8 sps:$4 sm:$0xff]   ;;  %v946_v57 = vld [vmem:[%s1261_s17 + $0xe4] ss:$8 sps:$4 sm:$0xff]  }
  0x69   : > { %v950_v58 = vld [vmem:[%s1261_s17 + $0xe0] ss:$8 sps:$4 sm:$0xff]   ;;  %v952_v59 = vld [vmem:[%s1261_s17 + $0xf4] ss:$8 sps:$4 sm:$0xff]   ;;  %v956_v60 = vld [vmem:[%s1261_s17 + $0xf0] ss:$8 sps:$4 sm:$0xff]  }
  0x6a   : > { %v1095_v0 = vmov 269488144   ;;  %v239_v7 = vld [vmem:[%s1386_s1] sm:$0x3]  ;;  %s820_s7 = smul.u32 96, %s1138_s16  ;;  %s202_s10 = scalar_lea.vmem [#allocation7], %s824_s4 }
  0x6b   : > { %565 = vmatpush1.bf16.xpose.msra.mxu0 %v894_v21  ;;  %v231_v1 = vunpack.c.l.s4 %v1095_v0  ;;  %v244_v9 = vrot.slane %v239_v7, %v243_v2  ;;  %v248_v10 = vrot.slane %v239_v7, %v247_v4  ;;  %s677_s29 = sshll.u32 %s202_s10, 4  ;;  %s663_s16 = scalar_lea.sflag [#allocation4], %s1257_s11  ;;  %s1343_s29 = int_to_ptr.vmem [resolvable:$true] %s677_s29 }
  0x6c   : > { %566 = vmatprep.subr.bf16.mxu0 %v895_v22  ;;  %s1341_s30 = scalar_lea.hbm %s1388_s3, %s820_s7  ;;  %s1018_s22 = scalar_lea.vmem %s1343_s29, 96 }
  0x6d   : > { %606 = vmatpush1.bf16.xpose.msra.mxu1 %v927_v27  ;;  %v232_v8 = vunpack.c.0.s8 %v231_v1  ;;  %v249_v12 = vcombine.low %v244_v9, %v248_v10  ;;  %p1019_p9 = scmp.ne.s32.totalorder %s1343_s29, %s1018_s22  ;;  %p1407_p10 = scmp.ne.s32.totalorder %s1396_s24, 0 }
  0x6e   : > { %607 = vmatprep.subr.bf16.mxu1 %v930_v28  ;;  %s1096_s27 = smov [#allocation7]  }
  0x6f   : > { %v235_v11 = vsub.s32 %v232_v8, %v1267_v3  ;;  %v256_v15 = vrot.slane %v249_v12, %v1270_v5  ;;  %p1020_p2 = pnand %p1019_p9, %p1407_p10  ;;  %s1022_s6 = sshll.u32 %s1096_s27, 4  ;;  %s1023_s6 = int_to_ptr.vmem [resolvable:$false] %s1022_s6 }
  0x70   : > { %s1024_s8 = scalar_lea.vmem %s1023_s6, 192  ;;  %p1025_p5 = scmp.lt.s32.totalorder %s1343_s29, %s1023_s6 }
  0x71   : > { %p1021_p4 = pneg %p1020_p2  ;;  %p1026_p0 = scmp.lt.s32.totalorder %s1024_s8, %s1018_s22 }
  0x73   : > { %567 = vmatpush1.bf16.xpose.msra.mxu0 %v897_v25  ;;  %p1027_p6 = por %p1026_p0, %p1025_p5 }
  0x74   : > { %568 = vmatprep.subr.bf16.mxu0 %v898_v26 }
  0x75   : > { %608 = vmatpush1.bf16.xpose.msra.mxu1 %v933_v31  ;;  %p1028_p13 = pnand %p1027_p6, %p1021_p4 }
  0x76   : > { %609 = vmatprep.subr.bf16.mxu1 %v936_v32 }
  0x7b   : > { %569 = vmatpush1.bf16.xpose.msra.mxu0 %v900_v29 }
  0x7c   : > { %570 = vmatprep.subr.bf16.mxu0 %v901_v30 }
  0x7d   : > { %610 = vmatpush1.bf16.xpose.msra.mxu1 %v939_v35 }
  0x7e   : > { %611 = vmatprep.subr.bf16.mxu1 %v942_v36 }
  0x83   : > { %571 = vmatpush1.bf16.xpose.msra.mxu0 %v903_v33 }
  0x84   : > { %572 = vmatprep.subr.bf16.mxu0 %v904_v34 }
  0x85   : > { %612 = vmatpush1.bf16.xpose.msra.mxu1 %v945_v39 }
  0x86   : > { %613 = vmatprep.subr.bf16.mxu1 %v948_v40 }
  0x8b   : > { %573 = vmatpush1.bf16.xpose.msra.mxu0 %v906_v37 }
  0x8c   : > { %574 = vmatprep.subr.bf16.mxu0 %v907_v38 }
  0x8d   : > { %614 = vmatpush1.bf16.xpose.msra.mxu1 %v951_v43 }
  0x8e   : > { %615 = vmatprep.subr.bf16.mxu1 %v954_v44 }
  0x93   : > { %575 = vmatpush1.bf16.xpose.msra.mxu0 %v909_v41 }
  0x94   : > { %576 = vmatprep.subr.bf16.mxu0 %v910_v42 }
  0x95   : > { %616 = vmatpush1.bf16.xpose.msra.mxu1 %v957_v47 }
  0x9b   : > { %577 = vmatpush1.bf16.xpose.msra.mxu0 %v914_v45 }
  0x9c   : > { %578 = vmatprep.subr.bf16.mxu0 %v916_v46 }
  0xa3   : > { %579 = vmatpush1.bf16.xpose.msra.mxu0 %v920_v48 }
  0xa4   : > { %580 = vmatprep.subr.bf16.mxu0 %v922_v49 }
  0xab   : > { %581 = vmatpush1.bf16.xpose.msra.mxu0 %v926_v50 }
  0xac   : > { %582 = vmatprep.subr.bf16.mxu0 %v928_v51 }
  0xb3   : > { %583 = vmatpush1.bf16.xpose.msra.mxu0 %v932_v52 }
  0xb4   : > { %584 = vmatprep.subr.bf16.mxu0 %v934_v53 }
  0xbb   : > { %585 = vmatpush1.bf16.xpose.msra.mxu0 %v938_v54 }
  0xbc   : > { %586 = vmatprep.subr.bf16.mxu0 %v940_v55 }
  0xc3   : > { %587 = vmatpush1.bf16.xpose.msra.mxu0 %v944_v56 }
  0xc4   : > { %588 = vmatprep.subr.bf16.mxu0 %v946_v57 }
  0xcb   : > { %589 = vmatpush1.bf16.xpose.msra.mxu0 %v950_v58 }
  0xcc   : > { %590 = vmatprep.subr.bf16.mxu0 %v952_v59 }
  0xd3   : > { %591 = vmatpush1.bf16.xpose.msra.mxu0 %v956_v60 }
  0xf3   : > { %v224_v61 = vpop.xlane.xlu0 %223 }
  0xf4   : > { %v226_v62 = vmul.f32 0.00390625, %v224_v61 }
  0xf6   : > { %v227_v63 = vadd.f32 1e-05, %v226_v62 }
  0xf8   : > { %958 = vrsqrt.f32 %v227_v63 }
 0x102   : > { %v959_v13 = vpop.eup %958 }
 0x103   : > { %v236_v14 = vrot.slane %v959_v13, %v235_v11 }
 0x105   : > { %v238_v16 = vmul.f32 %v236_v14, %v1272_v6 }
 0x107   : > { %v258_v17 = vmul.f32 %v256_v15, %v238_v16 }
 0x109   : > { %v266_v18 = vrot.slane %v258_v17, %v1270_v5 }
 0x10b   : > { %v267_v19 = vcombine.high %v266_v18, %v266_v18  ;;  %v270_v21 = vpack.c.bf16 %v266_v18, %v266_v18 }
 0x10d   : > { %v271_v20 = vpack.c.bf16 %v267_v19, %v267_v19 }
 0x10f   : > { %592 = vmatprep.mubr.bf16.mxu0 %v271_v20  ;;  %633 = vmatprep.mubr.bf16.mxu1 %v271_v20 }
 0x110   : > { %593 = vmatmul.mubr.bf16.vlgmr.msra.gmra.mrb[0].mxu0 %v270_v21  ;;  %634 = vmatmul.mubr.bf16.vlgmr.msra.gmra.mrb[0].mxu1 %v270_v21 }
 0x1e3   : > { %v594_v3 = vpop.f32.mrb[0].mxu0  ;;  %v635_v22 = vpop.f32.mrb[0].mxu1 }
 0x1e4   : > { %v596_v23 = vpop.f32.mrb[1].mxu0  ;;  %v637_v24 = vpop.f32.mrb[1].mxu1  ;;  %v658_v29 = vrot.slane %v635_v22, %v1270_v5 }
 0x1e5   : > { %v644_v25 = vcombine.low %v594_v3, %v596_v23  ;;  %v598_v26 = vpop.f32.mrb[2].mxu0  ;;  %v638_v6 = vpop.f32.mrb[2].mxu1 }
 0x1e6   : > { %v599_v27 = vpop.f32.mrb[3].mxu0  ;;  %v639_v28 = vpop.f32.mrb[3].mxu1 }
 0x1e7   : > { %v651_v30 = vrot.slane %v644_v25, %v1270_v5 }
 0x1e9   : > { %v659_v31 = vcombine.low %v651_v30, %v658_v29 }
 0x1eb   : > { %661 = vst [vmem:[%s202_s10] sm:$0x3f] %v659_v31 }
 0x1ec   : > { %1031 = shalt.err (!%p1028_p13)
}
 0x1ed   : > { %s1032_s9 = scalar_lea.hbm %s1341_s30, 96  ;;  %s1036_s5 = scalar_lea.hbm %s1388_s3, 192 }
 0x1ee   : > { %p1033_p7 = scmp.ne.s32.totalorder %s1341_s30, %s1032_s9  ;;  %p1037_p1 = scmp.lt.u32.totalorder %s1341_s30, %s1388_s3 }
 0x1ef   : > { %p1038_p8 = scmp.lt.u32.totalorder %s1036_s5, %s1032_s9  ;;  %p1040_p9 = scmp.lt.u32.totalorder %s1032_s9, %s1341_s30 }
 0x1f0   : > { %p1034_p3 = pnand %p1033_p7, %p1407_p10 }
 0x1f1   : > { %p1039_p11 = por %p1038_p8, %p1037_p1 }
 0x1f2   : > { %p1035_p12 = pneg %p1034_p3 }
 0x1f3   : > { %p1041_p2 = por %p1040_p9, %p1039_p11 }
 0x1f5   : > { %p1042_p4 = pnand %p1041_p2, %p1035_p12 }
 0x1f7   : > { %1045 = shalt.err (!%p1042_p4)
}
 0x1f8   : > { %831 = dma.vmem_to_hbm [thread:$0]  (%p1407_p10), %s1343_s29, 96, %s1341_s30, %s663_s16  }
 0x1f9 PF: > { %s689_s26 = sand.u32 1, %s1076_s12   ;;  %p1408_p5 = scmp.ne.s32.totalorder %s1397_s25, 0 }
 0x1fa   : > { %p1409_p0 = scmp.ge.s32.totalorder %s1088_s15, 2  ;;  %s690_s4 = scalar_lea.sflag [#allocation4], %s689_s26 }
 0x1fc   : > { %p842_p6 = pnand %p1409_p0, %p1408_p5 }
 0x1fe   : > { %1071 = dma.done.wait (!%p842_p6), %s690_s4, 96  }
 0x1ff   : > { %1073 = vsyncadd (!%p842_p6), %s690_s4, 4294967200  ;;  %p17_p13 = scmp.ge.s32.totalorder %s1142_s18, 4   ;;  %s1410_s12 = smov %s1080_s13 }
 0x200   : > { %s1411_s13 = smov %s1084_s14  ;;  %s1412_s14 = smov %s1154_s21 }
 0x201   : > { %s1413_s15 = smov %s1142_s18  ;;  %19 = sbr.rel (!%p17_p13) target bundleno = 6 (0x6), region = 82 }
 0x208   :  { %695 = vsyncpa [#allocation3], 1 }
 0x209   :  { %697 = vsyncpa [#allocation3 + $0x1], 1 }
 0x20a   :  { %698 = vsyncpa [#allocation6], 1 }
 0x20b   :  { %700 = vsyncpa [#allocation6 + $0x1], 1 }
 0x20c   :  { %701 = vsyncpa [#allocation4], 1 }
 0x20d   :  { %703 = vsyncpa [#allocation4 + $0x1], 1 }

</bundles_post_ra>
